<compile_context>
chip_gen: v5e
topology: v5e:2x2
jax: 0.10.0
libtpu: 0.0.40
codegen_flags: <defaults>
</compile_context>

<pallas_src>
import functools

import jax
import jax.numpy as jnp
from jax import lax
from jax.experimental import pallas as pl
from jax.experimental.pallas import tpu as pltpu


def _gln_kernel(x_ref, red_ref, bcast_ref, w_ref, b_ref, o_ref, *, eps):
    """Normalize one (TC, TL) tile of the flattened (N*C, L) tensor.

    red_ref   : (TG, TC) group-averaging matrix (1/cg on group members, else 0)
    bcast_ref : (TC, TG) one-hot group->row broadcast matrix
    w_ref/b_ref : (TC, 1) f32 affine params (weight/bias tiled over packed batches)
    """
    x = x_ref[...].astype(jnp.float32)
    red = red_ref[...]
    bca = bcast_ref[...]
    hi = lax.Precision.HIGHEST  # full-f32-accurate statistics on the MXU

    # Two-pass group statistics (reduce over rows, broadcast back) — matches
    # the torch reference numerically (no E[x^2]-mu^2 cancellation).
    mu_g = jnp.dot(red, x, precision=hi, preferred_element_type=jnp.float32)
    mu = jnp.dot(bca, mu_g, precision=hi, preferred_element_type=jnp.float32)
    d = x - mu
    var_g = jnp.dot(red, d * d, precision=hi, preferred_element_type=jnp.float32)
    rsig_g = lax.rsqrt(var_g + eps)                       # EUP; only TG rows
    rsig = jnp.dot(bca, rsig_g, precision=hi, preferred_element_type=jnp.float32)

    o_ref[...] = (w_ref[...] * (d * rsig) + b_ref[...]).astype(o_ref.dtype)


def _vmem_capacity_bytes():
    """Per-TensorCore VMEM capacity; conservative default if unavailable."""
    try:
        cap = getattr(pltpu.get_tpu_info(), "vmem_capacity_bytes", None)
        if cap:
            return int(cap)
    except Exception:
        pass
    return 64 << 20  # v7x per-TensorCore VMEM (smallest of v5e/v6e/v7x)


def _rows_per_block(n, c):
    """Rows per tile = BN*C with BN | N (tiles never straddle a batch/group).

    Prefer a sublane-aligned (multiple of 8) row count and pack several batches
    per step when C is tiny; fall back to the full (N*C) extent otherwise."""
    limit = min(n, 64)
    aligned = [d for d in range(1, limit + 1) if n % d == 0 and (d * c) % 8 == 0]
    if not aligned:
        return n * c          # block == full dim: always legal
    bn = aligned[0]
    for d in aligned:
        if d * c <= 64:       # keep the packed row count modest
            bn = d
    return bn * c


def group_layer_norm_1d(x, weight, bias, groups=1, eps=1e-6, block_l=1024):
    """GroupLayerNorm1d forward. x: (N, C, L); weight/bias: (C,)."""
    N, C, L = x.shape
    assert C % groups == 0
    cg = C // groups

    NC = N * C
    x2 = x.reshape(NC, L)                     # free reshape: batch -> rows

    TC = _rows_per_block(N, C)                # rows per tile (multiple of C)
    BN = TC // C                              # batches packed per tile
    TG = TC // cg                             # groups per tile

    # Lane tile: multiple of 128 (or the full L extent), sized from the actual
    # chip's VMEM so the double-buffered pipeline fits on v5e/v6e/v7x alike.
    cap = _vmem_capacity_bytes()
    vmem_limit = int(min(cap // 2, 64 << 20))  # ~32 MiB on v7x, 64 MiB on v5e/v6e
    TL = 128
    while TL * 2 <= max(block_l, 128):
        TL *= 2
    while TL > 128 and 6 * TC * TL * 4 > vmem_limit // 2:
        TL //= 2
    if L <= TL:
        TL = L                                # single full-extent lane block

    # One-time host-side constants (no per-grid-step relayouts).
    gid = jnp.arange(TC, dtype=jnp.int32) // cg
    onehot = gid[None, :] == jnp.arange(TG, dtype=jnp.int32)[:, None]
    red = onehot.astype(jnp.float32) / float(cg)            # (TG, TC)
    bcast = onehot.T.astype(jnp.float32)                    # (TC, TG)
    w2 = jnp.tile(weight.astype(jnp.float32), (BN,)).reshape(TC, 1)
    b2 = jnp.tile(bias.astype(jnp.float32), (BN,)).reshape(TC, 1)

    kernel = functools.partial(_gln_kernel, eps=float(eps))

    out = pl.pallas_call(
        kernel,
        out_shape=jax.ShapeDtypeStruct((NC, L), x.dtype),
        grid_spec=pltpu.PrefetchScalarGridSpec(
            num_scalar_prefetch=0,
            grid=(NC // TC, pl.cdiv(L, TL)),
            in_specs=[
                pl.BlockSpec((TC, TL), lambda i, l: (i, l)),
                pl.BlockSpec((TG, TC), lambda i, l: (0, 0)),
                pl.BlockSpec((TC, TG), lambda i, l: (0, 0)),
                pl.BlockSpec((TC, 1), lambda i, l: (0, 0)),
                pl.BlockSpec((TC, 1), lambda i, l: (0, 0)),
            ],
            out_specs=pl.BlockSpec((TC, TL), lambda i, l: (i, l)),
        ),
        compiler_params=pltpu.CompilerParams(
            dimension_semantics=("parallel", "parallel"),
            vmem_limit_bytes=vmem_limit,
        ),
    )(x2, red, bcast, w2, b2)

    return out.reshape(N, C, L)


def _reference(x, weight, bias, groups, eps):
    N, C, L = x.shape
    xg = x.reshape(N, groups, C // groups, L).astype(jnp.float32)
    mu = jnp.mean(xg, axis=2, keepdims=True)
    var = jnp.mean((xg - mu) ** 2, axis=2, keepdims=True)
    y = ((xg - mu) / jnp.sqrt(var + eps)).reshape(N, C, L)
    w = weight.astype(jnp.float32).reshape(1, C, 1)
    b = bias.astype(jnp.float32).reshape(1, C, 1)
    return (w * y + b).astype(x.dtype)


if __name__ == "__main__":
    key = jax.random.PRNGKey(0)
    k1, k2, k3, k4, k5, k6 = jax.random.split(key, 6)

    # Case 1: small module-consistent shape, default-style params / eps.
    N, C, L, groups, eps = 2, 4, 16, 2, 1e-6
    x = jax.random.normal(k1, (N, C, L), dtype=jnp.float32)
    weight = jnp.ones((C,), dtype=jnp.float32)     # matches module __init__
    bias = jnp.zeros((C,), dtype=jnp.float32)
    out = jax.block_until_ready(group_layer_norm_1d(x, weight, bias, groups, eps))
    ref = _reference(x, weight, bias, groups, eps)
    assert out.shape == (N, C, L)
    assert jnp.allclose(out, ref, atol=1e-3, rtol=1e-3)

    # Case 2: shifted/scaled data, non-trivial affine, groups=4.
    N, C, L, groups, eps = 2, 8, 200, 4, 1e-4
    x = jax.random.normal(k2, (N, C, L), dtype=jnp.float32) * 3.0 + 1.5
    weight = jax.random.normal(k3, (C,), dtype=jnp.float32)
    bias = jax.random.normal(k4, (C,), dtype=jnp.float32)
    out = jax.block_until_ready(group_layer_norm_1d(x, weight, bias, groups, eps))
    ref = _reference(x, weight, bias, groups, eps)
    assert out.shape == (N, C, L)
    assert jnp.allclose(out, ref, atol=1e-3, rtol=1e-3)

    # Case 3: L not a multiple of the lane tile -> exercises the masked
    # partial-last-block path (no host-side padding), 4-channel groups.
    N, C, L, groups, eps = 2, 8, 300, 2, 1e-6
    x = jax.random.normal(k5, (N, C, L), dtype=jnp.float32)
    weight = jax.random.normal(k6, (C,), dtype=jnp.float32) * 0.5 + 1.0
    bias = jnp.zeros((C,), dtype=jnp.float32)
    out = jax.block_until_ready(
        group_layer_norm_1d(x, weight, bias, groups, eps, block_l=128))
    ref = _reference(x, weight, bias, groups, eps)
    assert out.shape == (N, C, L)
    assert jnp.allclose(out, ref, atol=1e-3, rtol=1e-3)

    # TODO(synk): only the forward pass is implemented; the module's custom
    # autograd backward is out of scope here.
    print("KERNEL_OK")
</pallas_src>

<mosaic_0001>
module attributes {stable_mosaic.version = 11 : i64} {
  func.func @_gln_kernel(%arg0: i32, %arg1: i32, %arg2: memref<8x16xf32, #tpu.memory_space<vmem>>, %arg3: memref<4x8xf32, #tpu.memory_space<vmem>>, %arg4: memref<8x4xf32, #tpu.memory_space<vmem>>, %arg5: memref<8x1xf32, #tpu.memory_space<vmem>>, %arg6: memref<8x1xf32, #tpu.memory_space<vmem>>, %arg7: memref<8x16xf32, #tpu.memory_space<vmem>>) attributes {dimension_semantics = [#tpu.dimension_semantics<parallel>, #tpu.dimension_semantics<parallel>], iteration_bounds = array<i64: 1, 1>, scalar_prefetch = 0 : i64, scratch_operands = 0 : i64, tpu.core_type = #tpu.core_type<tc>, window_params = [{transform_indices = @transform_0, window_bounds = array<i64: 8, 16>}, {pipeline_mode = #tpu.pipeline_mode<synchronous>, transform_indices = @transform_1, window_bounds = array<i64: 4, 8>}, {pipeline_mode = #tpu.pipeline_mode<synchronous>, transform_indices = @transform_2, window_bounds = array<i64: 8, 4>}, {pipeline_mode = #tpu.pipeline_mode<synchronous>, transform_indices = @transform_3, window_bounds = array<i64: 8, 1>}, {pipeline_mode = #tpu.pipeline_mode<synchronous>, transform_indices = @transform_4, window_bounds = array<i64: 8, 1>}, {transform_indices = @transform_5, window_bounds = array<i64: 8, 16>}]} {
    %c0 = arith.constant 0 : index
    %c0_0 = arith.constant 0 : index
    %0 = vector.load %arg2[%c0, %c0_0] : memref<8x16xf32, #tpu.memory_space<vmem>>, vector<8x16xf32>
    %c0_1 = arith.constant 0 : index
    %c0_2 = arith.constant 0 : index
    %1 = vector.load %arg3[%c0_1, %c0_2] : memref<4x8xf32, #tpu.memory_space<vmem>>, vector<4x8xf32>
    %c0_3 = arith.constant 0 : index
    %c0_4 = arith.constant 0 : index
    %2 = vector.load %arg4[%c0_3, %c0_4] : memref<8x4xf32, #tpu.memory_space<vmem>>, vector<8x4xf32>
    %cst = arith.constant dense<0.000000e+00> : vector<4x16xf32>
    %3 = tpu.matmul %1, %0, %cst {dimension_numbers = #tpu.dot_dimension_numbers<[1], [0], [0], [1], [0, 0, 1, 1], [], []>, precision = #tpu.contract_precision<fp32>} : vector<4x8xf32>, vector<8x16xf32>, vector<4x16xf32> -> vector<4x16xf32>
    %cst_5 = arith.constant dense<0.000000e+00> : vector<8x16xf32>
    %4 = tpu.matmul %2, %3, %cst_5 {dimension_numbers = #tpu.dot_dimension_numbers<[1], [0], [0], [1], [0, 0, 1, 1], [], []>, precision = #tpu.contract_precision<fp32>} : vector<8x4xf32>, vector<4x16xf32>, vector<8x16xf32> -> vector<8x16xf32>
    %5 = arith.subf %0, %4 : vector<8x16xf32>
    %6 = arith.mulf %5, %5 : vector<8x16xf32>
    %cst_6 = arith.constant dense<0.000000e+00> : vector<4x16xf32>
    %7 = tpu.matmul %1, %6, %cst_6 {dimension_numbers = #tpu.dot_dimension_numbers<[1], [0], [0], [1], [0, 0, 1, 1], [], []>, precision = #tpu.contract_precision<fp32>} : vector<4x8xf32>, vector<8x16xf32>, vector<4x16xf32> -> vector<4x16xf32>
    %cst_7 = arith.constant 9.99999997E-7 : f32
    %8 = vector.broadcast %cst_7 : f32 to vector<4x16xf32>
    %9 = arith.addf %7, %8 : vector<4x16xf32>
    %10 = math.rsqrt %9 : vector<4x16xf32>
    %cst_8 = arith.constant dense<0.000000e+00> : vector<8x16xf32>
    %11 = tpu.matmul %2, %10, %cst_8 {dimension_numbers = #tpu.dot_dimension_numbers<[1], [0], [0], [1], [0, 0, 1, 1], [], []>, precision = #tpu.contract_precision<fp32>} : vector<8x4xf32>, vector<4x16xf32>, vector<8x16xf32> -> vector<8x16xf32>
    %c0_9 = arith.constant 0 : index
    %c0_10 = arith.constant 0 : index
    %12 = vector.load %arg5[%c0_9, %c0_10] : memref<8x1xf32, #tpu.memory_space<vmem>>, vector<8x1xf32>
    %13 = arith.mulf %5, %11 : vector<8x16xf32>
    %14 = vector.broadcast %12 : vector<8x1xf32> to vector<8x16xf32>
    %15 = arith.mulf %14, %13 : vector<8x16xf32>
    %c0_11 = arith.constant 0 : index
    %c0_12 = arith.constant 0 : index
    %16 = vector.load %arg6[%c0_11, %c0_12] : memref<8x1xf32, #tpu.memory_space<vmem>>, vector<8x1xf32>
    %17 = vector.broadcast %16 : vector<8x1xf32> to vector<8x16xf32>
    %18 = arith.addf %15, %17 : vector<8x16xf32>
    %c0_13 = arith.constant 0 : index
    %c0_14 = arith.constant 0 : index
    %19 = vector.load %arg7[%c0_13, %c0_14] : memref<8x16xf32, #tpu.memory_space<vmem>>, vector<8x16xf32>
    tpu.vector_store %arg7[%c0_13, %c0_14], %18 {strides = array<i32>} : memref<8x16xf32, #tpu.memory_space<vmem>>, vector<8x16xf32>,
    return
  }
  func.func @transform_0(%arg0: i32, %arg1: i32) -> (i32, i32) {
    %c0_i32 = arith.constant 0 : i32
    return %arg0, %arg1 : i32, i32
  }
  func.func @transform_1(%arg0: i32, %arg1: i32) -> (i32, i32) {
    %c0_i32 = arith.constant 0 : i32
    %c0_i32_0 = arith.constant 0 : i32
    %c0_i32_1 = arith.constant 0 : i32
    return %c0_i32, %c0_i32_0 : i32, i32
  }
  func.func @transform_2(%arg0: i32, %arg1: i32) -> (i32, i32) {
    %c0_i32 = arith.constant 0 : i32
    %c0_i32_0 = arith.constant 0 : i32
    %c0_i32_1 = arith.constant 0 : i32
    return %c0_i32, %c0_i32_0 : i32, i32
  }
  func.func @transform_3(%arg0: i32, %arg1: i32) -> (i32, i32) {
    %c0_i32 = arith.constant 0 : i32
    %c0_i32_0 = arith.constant 0 : i32
    %c0_i32_1 = arith.constant 0 : i32
    return %c0_i32, %c0_i32_0 : i32, i32
  }
  func.func @transform_4(%arg0: i32, %arg1: i32) -> (i32, i32) {
    %c0_i32 = arith.constant 0 : i32
    %c0_i32_0 = arith.constant 0 : i32
    %c0_i32_1 = arith.constant 0 : i32
    return %c0_i32, %c0_i32_0 : i32, i32
  }
  func.func @transform_5(%arg0: i32, %arg1: i32) -> (i32, i32) {
    %c0_i32 = arith.constant 0 : i32
    return %arg0, %arg1 : i32, i32
  }
}

</mosaic_0001>

<bundles_post_ra>
// kernel: tpu_custom_call.1
= control target key start
LH: loop header
LB: loop body
LE: loop exit
PB: predicated region body
PF: predicated region fallthrough
CT: control target
= control target key end

     0   :  { %vm24_vm0 = vcmask 64512   ;;  %s805_s0 = inlined_call_operand.vmem [shape: f32[8,16], index: 0, kind: input, shape index: {}]   ;;  %s806_s1 = inlined_call_operand.vmem [shape: f32[4,8], index: 1, kind: input, shape index: {}]   ;;  %s807_s2 = inlined_call_operand.vmem [shape: f32[8,4], index: 2, kind: input, shape index: {}]   ;;  %s808_s3 = inlined_call_operand.vmem [shape: f32[8,1], index: 3, kind: input, shape index: {}]   ;;  %s809_s4 = inlined_call_operand.vmem [shape: f32[8,1], index: 4, kind: input, shape index: {}]   ;;  %s810_s5 = inlined_call_operand.hbm [shape: f32[8,16], index: 5, kind: output, shape index: {}]  }
   0x1   :  { %v734_v0 = vld [vmem:[%s805_s0] sm:$0xff] }
   0x2   :  { %v22_v1 = vld [vmem:[%s806_s1] sm:$0xf] }
   0x3   :  { %10 = vsyncpa [#allocation3], 0  ;;  %v43_v2 = vand.u32 4294901760, %v734_v0  ;;  %v26_v3 = vsel %vm24_vm0, %v22_v1, 0  ;;  %v23_v13 = vld [vmem:[%s807_s2] sm:$0xff]  ;;  %vm174_vm1 = vcmask 31744  }
   0x4   :  { %v740_v4 = vand.u32 4294901760, %v26_v3  ;;  %v176_v14 = vsel %vm174_vm1, %v23_v13, 0  ;;  %vm178_vm2 = vcmask 1043456   ;;  %s659_s27 = sshll.u32 %s810_s5, 4  ;;  %vm650_vm6 = vcmask 130048   ;;  %s660_s27 = int_to_ptr.hbm [resolvable:$true] %s659_s27 }
   0x5   :  { %v70_v5 = vsub.f32 %v734_v0, %v43_v2  ;;  %120 = vmatpush.msra.mxu3 %v43_v2  ;;  %44 = vmatpush.msra.mxu0 %v43_v2  ;;  %v759_v15 = vand.u32 4294901760, %v176_v14 }
   0x6   :  { %v744_v6 = vsub.f32 %v26_v3, %v740_v4 }
   0x7   :  { %97 = vmatpush.msra.mxu2 %v70_v5  ;;  %v71_v7 = vand.u32 4294901760, %v70_v5  ;;  %v762_v20 = vsub.f32 %v176_v14, %v759_v15 }
   0x8   :  { %100 = vmatmul.f32.vlgmr.msra.gmra.mxu2 %v744_v6  ;;  %v748_v8 = vand.u32 4294901760, %v744_v6 }
   0x9   :  { %v72_v9 = vsub.f32 %v70_v5, %v71_v7  ;;  %146 = vmatpush.msrb.mxu0 %v71_v7  ;;  %v765_v23 = vand.u32 4294901760, %v762_v20  ;;  %v635_v5 = vld [vmem:[%s808_s3] sm:$0xff]  ;;  %s700_s3 = smov [#allocation2]  }
   0xa   :  { %124 = vmatmul.f32.vlgmr.msra.gmra.mxu3 %v748_v8  ;;  %v48_v10 = vsub.f32 %v744_v6, %v748_v8 }
   0xb   :  { %v73_v11 = vand.u32 4294901760, %v72_v9  ;;  %v202_v28 = vsub.f32 %v762_v20, %v765_v23 }
   0xc   :  { %v49_v12 = vand.u32 4294901760, %v48_v10  ;;  %v643_v10 = vld [vmem:[%s809_s4] sm:$0xff]  ;;  %s657_s4 = sshll.u32 %s700_s3, 4  ;;  %s658_s4 = int_to_ptr.vmem [resolvable:$true] %s657_s4 }
   0xd   :  { %74 = vmatpush.msra.mxu1 %v73_v11  ;;  %v770_v31 = vand.u32 4294901760, %v202_v28 }
   0xe   :  { %50 = vmatmul.f32.vlgmr.msra.gmra.mxu0 %v49_v12  ;;  %76 = vmatmul.f32.vlgmr.msra.gmra.mxu1 %v740_v4 }
   0xf   :  { %168 = vmatpush.msrb.mxu1 %v43_v2 }
  0x16   :  { %148 = vmatmul.f32.vlgmr.msrb.gmra.mxu0 %v740_v4  ;;  %170 = vmatmul.f32.vlgmr.msrb.gmra.mxu1 %v740_v4 }
  0x8b   :  { %v51_v16 = vpop.f32.mrf.mxu0  ;;  %v77_v17 = vpop.f32.mrf.mxu1 }
  0x8c   :  { %v78_v18 = vadd.f32 %v77_v17, %v51_v16  ;;  %v101_v19 = vpop.f32.mrf.mxu2 }
  0x8d   :  { %v125_v22 = vpop.f32.mrf.mxu3 }
  0x8e   :  { %v102_v21 = vadd.f32 %v101_v19, %v78_v18 }
  0x90   :  { %v126_v24 = vadd.f32 %v125_v22, %v102_v21 }
  0x93   :  { %v149_v25 = vpop.f32.mrf.mxu0  ;;  %v171_v26 = vpop.f32.mrf.mxu1 }
  0x94   :  { %v150_v27 = vadd.f32 %v149_v25, %v126_v24 }
  0x96   :  { %v172_v29 = vadd.f32 %v171_v26, %v150_v27 }
  0x98   :  { %v180_v30 = vsel %vm178_vm2, %v172_v29, 0 }
  0x99   :  { %v197_v32 = vand.u32 4294901760, %v180_v30 }
  0x9b   :  { %v224_v33 = vsub.f32 %v180_v30, %v197_v32  ;;  %198 = vmatpush.msrb.mxu2 %v197_v32  ;;  %274 = vmatpush.msra.mxu1 %v197_v32 }
  0x9c   :  { %204 = vmatmul.f32.vlgmr.msrb.gmra.mxu2 %v770_v31  ;;  %278 = vmatmul.f32.vlgmr.msra.gmra.mxu1 %v765_v23 }
  0x9d   :  { %251 = vmatpush.msra.mxu0 %v224_v33  ;;  %v225_v34 = vand.u32 4294901760, %v224_v33 }
  0x9e   :  { %254 = vmatmul.f32.vlgmr.msra.gmra.mxu0 %v762_v20 }
  0x9f   :  { %300 = vmatpush.msra.mxu2 %v225_v34  ;;  %v226_v35 = vsub.f32 %v224_v33, %v225_v34 }
  0xa1   :  { %v227_v36 = vand.u32 4294901760, %v226_v35 }
  0xa3   :  { %228 = vmatpush.msrb.mxu3 %v227_v36 }
  0xa4   :  { %230 = vmatmul.f32.vlgmr.msrb.gmra.mxu3 %v759_v15  ;;  %302 = vmatmul.f32.vlgmr.msra.gmra.mxu2 %v759_v15 }
  0xa5   :  { %322 = vmatpush.msra.mxu3 %v197_v32 }
  0xac   :  { %324 = vmatmul.f32.vlgmr.msra.gmra.mxu3 %v759_v15 }
 0x119   :  { %v279_v41 = vpop.f32.mrf.mxu1 }
 0x11b   :  { %v255_v39 = vpop.f32.mrf.mxu0 }
 0x11f   :  { %v205_v37 = vpop.f32.mrf.mxu2 }
 0x127   :  { %v231_v38 = vpop.f32.mrf.mxu3  ;;  %v303_v43 = vpop.f32.mrf.mxu2 }
 0x128   :  { %v232_v40 = vadd.f32 %v231_v38, %v205_v37 }
 0x12a   :  { %v256_v42 = vadd.f32 %v255_v39, %v232_v40 }
 0x12c   :  { %v280_v44 = vadd.f32 %v279_v41, %v256_v42 }
 0x12e   :  { %v304_v45 = vadd.f32 %v303_v43, %v280_v44 }
 0x12f   :  { %v325_v46 = vpop.f32.mrf.mxu3 }
 0x130   :  { %v326_v47 = vadd.f32 %v325_v46, %v304_v45 }
 0x132   :  { %v779_v48 = vsub.f32 %v734_v0, %v326_v47 }
 0x134   :  { %v329_v49 = vmul.f32 %v779_v48, %v779_v48 }
 0x136   :  { %v345_v50 = vand.u32 4294901760, %v329_v49 }
 0x138   :  { %v372_v51 = vsub.f32 %v329_v49, %v345_v50  ;;  %346 = vmatpush.msrb.mxu0 %v345_v50  ;;  %422 = vmatpush.msrb.mxu3 %v345_v50 }
 0x139   :  { %352 = vmatmul.f32.vlgmr.msrb.gmra.mxu0 %v49_v12  ;;  %426 = vmatmul.f32.vlgmr.msrb.gmra.mxu3 %v748_v8 }
 0x13a   :  { %399 = vmatpush.msrb.mxu2 %v372_v51  ;;  %v373_v52 = vand.u32 4294901760, %v372_v51 }
 0x13b   :  { %402 = vmatmul.f32.vlgmr.msrb.gmra.mxu2 %v744_v6 }
 0x13c   :  { %448 = vmatpush.msra.mxu0 %v373_v52  ;;  %v374_v53 = vsub.f32 %v372_v51, %v373_v52 }
 0x13e   :  { %v375_v54 = vand.u32 4294901760, %v374_v53 }
 0x140   :  { %376 = vmatpush.msrb.mxu1 %v375_v54 }
 0x141   :  { %378 = vmatmul.f32.vlgmr.msrb.gmra.mxu1 %v740_v4  ;;  %450 = vmatmul.f32.vlgmr.msra.gmra.mxu0 %v740_v4 }
 0x142   :  { %470 = vmatpush.msra.mxu1 %v345_v50 }
 0x149   :  { %472 = vmatmul.f32.vlgmr.msra.gmra.mxu1 %v740_v4  ;;  %v699_v4 = vmov 0  }
 0x14a   :  { %670 = vset.pattern.permute.xlu0 %v699_v4 }
 0x14b   :  { %639 = vperm.xlu0 %670, %v635_v5  }
 0x153   :  { %646 = vperm.xlu0 %670, %v643_v10  }
 0x1b6   :  { %v353_v55 = vpop.f32.mrf.mxu0 }
 0x1b7   :  { %v354_v56 = vadd.f32 1e-06, %v353_v55 }
 0x1bc   :  { %v427_v60 = vpop.f32.mrf.mxu3 }
 0x1bd   :  { %v640_v27 = vpop.permute.xlu0 %639 }
 0x1be   :  { %v379_v57 = vpop.f32.mrf.mxu1  ;;  %v403_v58 = vpop.f32.mrf.mxu2 }
 0x1bf   :  { %v380_v59 = vadd.f32 %v379_v57, %v354_v56  ;;  %v451_v62 = vpop.f32.mrf.mxu0 }
 0x1c1   :  { %v404_v61 = vadd.f32 %v403_v58, %v380_v59 }
 0x1c3   :  { %v428_v63 = vadd.f32 %v427_v60, %v404_v61 }
 0x1c5   :  { %v452_v0 = vadd.f32 %v451_v62, %v428_v63  ;;  %v647_v33 = vpop.permute.xlu0 %646 }
 0x1c6   :  { %v473_v1 = vpop.f32.mrf.mxu1 }
 0x1c7   :  { %v474_v2 = vadd.f32 %v473_v1, %v452_v0 }
 0x1c9   :  { %671 = vrsqrt.f32 %v474_v2  ;;  %vm482_vm4 = vweird.f32 %v474_v2 }
 0x1cf   :  { %v672_v3 = vpop.eup %671 }
 0x1d0   :  { %v477_v6 = vmul.f32 %v672_v3, %v474_v2  ;;  %vm483_vm3 = vweird.f32 %v672_v3 }
 0x1d1   :  { %vm484_vm5 = vmor %vm482_vm4, %vm483_vm3 }
 0x1d2   :  { %v478_v7 = vmul.f32 %v672_v3, %v477_v6 }
 0x1d4   :  { %v479_v8 = vmul.f32 0.5, %v478_v7 }
 0x1d6   :  { %v480_v9 = vsub.f32 1.5, %v479_v8 }
 0x1d8   :  { %v481_v11 = vmul.f32 %v672_v3, %v480_v9 }
 0x1da   :  { %v485_v12 = vsel %vm484_vm5, %v672_v3, %v481_v11 }
 0x1db   :  { %v487_v13 = vsel %vm178_vm2, %v485_v12, 0 }
 0x1dc   :  { %v504_v14 = vand.u32 4294901760, %v487_v13 }
 0x1de   :  { %505 = vmatpush.msra.mxu2 %v504_v14  ;;  %581 = vmatpush.msrb.mxu1 %v504_v14  ;;  %v531_v16 = vsub.f32 %v487_v13, %v504_v14 }
 0x1df   :  { %511 = vmatmul.f32.vlgmr.msra.gmra.mxu2 %v770_v31  ;;  %585 = vmatmul.f32.vlgmr.msrb.gmra.mxu1 %v765_v23 }
 0x1e0   :  { %558 = vmatpush.msrb.mxu0 %v531_v16  ;;  %v532_v17 = vand.u32 4294901760, %v531_v16 }
 0x1e1   :  { %561 = vmatmul.f32.vlgmr.msrb.gmra.mxu0 %v762_v20 }
 0x1e2   :  { %607 = vmatpush.msrb.mxu2 %v532_v17  ;;  %v533_v18 = vsub.f32 %v531_v16, %v532_v17 }
 0x1e4   :  { %v534_v19 = vand.u32 4294901760, %v533_v18 }
 0x1e6   :  { %535 = vmatpush.msra.mxu3 %v534_v19 }
 0x1e7   :  { %537 = vmatmul.f32.vlgmr.msra.gmra.mxu3 %v759_v15  ;;  %609 = vmatmul.f32.vlgmr.msrb.gmra.mxu2 %v759_v15 }
 0x1e8   :  { %629 = vmatpush.msrb.mxu3 %v504_v14 }
 0x1ef   :  { %631 = vmatmul.f32.vlgmr.msrb.gmra.mxu3 %v759_v15 }
 0x25c   :  { %v586_v23 = vpop.f32.mrf.mxu1 }
 0x25e   :  { %v562_v24 = vpop.f32.mrf.mxu0 }
 0x262   :  { %v512_v21 = vpop.f32.mrf.mxu2 }
 0x26a   :  { %v538_v22 = vpop.f32.mrf.mxu3  ;;  %v610_v28 = vpop.f32.mrf.mxu2 }
 0x26b   :  { %v539_v25 = vadd.f32 %v538_v22, %v512_v21 }
 0x26d   :  { %v563_v26 = vadd.f32 %v562_v24, %v539_v25 }
 0x26f   :  { %v587_v20 = vadd.f32 %v586_v23, %v563_v26 }
 0x271   :  { %v611_v29 = vadd.f32 %v610_v28, %v587_v20 }
 0x272   :  { %v632_v30 = vpop.f32.mrf.mxu3 }
 0x273   :  { %v633_v31 = vadd.f32 %v632_v30, %v611_v29 }
 0x275   :  { %v636_v32 = vmul.f32 %v633_v31, %v779_v48 }
 0x277   :  { %v642_v15 = vmul.f32 %v640_v27, %v636_v32 }
 0x279   :  { %v649_v34 = vadd.f32 %v647_v33, %v642_v15 }
 0x27b   :  { %651 = vst.msk [vmem:[#allocation2] sm:$0xff] %vm650_vm6, %v649_v34 }
 0x27c   :  { %662 = dma.vmem_to_hbm [thread:$0]  %s658_s4, 128, %s660_s27, [#allocation3]  }
 0x27d   :  { %697 = dma.done.wait [#allocation3], 128  }
 0x27e   :  { %698 = vsyncadd [#allocation3], 4294967168 }
 0x27f   :  { %667 = vsyncpa [#allocation3], 1 }

</bundles_post_ra>
